<compile_context>
chip_gen: v7x
topology: tpu7x:2x2x1
jax: 0.10.0
libtpu: 0.0.40
codegen_flags: <defaults>
</compile_context>

<pallas_src>
import jax
import jax.numpy as jnp
from jax import lax
from jax.experimental import pallas as pl
from jax.experimental.pallas import tpu as pltpu


def agent_kernel(h_ref, w1_ref, b1_ref, wh_ref, bh_ref, heads_ref):
    # shared = ReLU(h @ W1 + b1)   -- MXU in bf16, f32 accumulation
    x = jnp.dot(h_ref[...].astype(jnp.bfloat16),
                w1_ref[...].astype(jnp.bfloat16),
                preferred_element_type=jnp.float32)
    x = jnp.maximum(x + b1_ref[...], 0.0)

    # all three heads fused: columns [gaze_dx, gaze_dy, stop_logit, value]
    heads = jnp.dot(x.astype(jnp.bfloat16),
                    wh_ref[...].astype(jnp.bfloat16),
                    preferred_element_type=jnp.float32)
    heads = heads + bh_ref[...]

    # tanh only on the first two (gaze_mean) columns; tanh runs on the EUP
    # (free slot) so computing it on all 4 columns and masking is cheap.
    col = lax.broadcasted_iota(jnp.int32, heads.shape, 1)
    heads_ref[...] = jnp.where(col < 2, jnp.tanh(heads), heads).astype(heads_ref.dtype)


def _choose_tile_b(B):
    # Whole batch as one block for modest B; 1024-row tiles (multiple of 256,
    # fits default scoped VMEM with double buffering at H=512) for large B.
    if B <= 1024:
        return B
    return 1024


def agent_forward(h, params, tile_b=None):
    """Returns (gaze_mean (B,2), gaze_std (2,), stop_logit (B,1), state_value (B,))."""
    w1, b1, wh, bh, log_std = (params["w1"], params["b1"], params["wh"],
                               params["bh"], params["log_std"])
    B, H = h.shape
    Hh = w1.shape[1]

    if tile_b is None:
        tile_b = _choose_tile_b(B)
    tile_b = min(tile_b, B)
    grid = (pl.cdiv(B, tile_b),)

    b1_2d = b1.reshape(1, Hh)
    bh_2d = bh.reshape(1, 4)

    cost = pl.CostEstimate(
        flops=2 * B * H * Hh + 2 * B * Hh * 4,
        transcendentals=2 * B,                      # tanh on the two gaze columns
        bytes_accessed=4 * (B * H + H * Hh + Hh + Hh * 4 + 4 + B * 4),
    )

    heads = pl.pallas_call(
        agent_kernel,
        out_shape=jax.ShapeDtypeStruct((B, 4), jnp.float32),
        grid_spec=pltpu.PrefetchScalarGridSpec(
            num_scalar_prefetch=0,
            grid=grid,
            in_specs=[
                pl.BlockSpec((tile_b, H), lambda i: (i, 0)),   # h: streamed per tile
                pl.BlockSpec((H, Hh), lambda i: (0, 0)),        # weights/biases stay
                pl.BlockSpec((1, Hh), lambda i: (0, 0)),        # resident (constant
                pl.BlockSpec((Hh, 4), lambda i: (0, 0)),        # block index -> no
                pl.BlockSpec((1, 4), lambda i: (0, 0)),         # re-DMA per step)
            ],
            out_specs=pl.BlockSpec((tile_b, 4), lambda i: (i, 0)),
        ),
        compiler_params=pltpu.CompilerParams(
            dimension_semantics=("parallel",)),     # shard batch tiles across TCs (v7x)
        cost_estimate=cost,
    )(h, w1, b1_2d, wh, bh_2d)

    gaze_mean = heads[:, 0:2]
    stop_logit = heads[:, 2:3]
    state_value = heads[:, 3]                       # == .squeeze(-1) of the value head
    # Parameter-only path, hoisted out of the kernel (no dependence on h).
    gaze_std = jnp.clip(jnp.exp(log_std), 0.01, 1.0)
    return gaze_mean, gaze_std, stop_logit, state_value


def init_params(key, hidden_size):
    """Deterministic init mimicking nn.Linear defaults (U(-1/sqrt(fan_in), ...))."""
    Hh = hidden_size // 2
    k1, k2, k3, k4, k5, k6, k7, k8 = jax.random.split(key, 8)

    def lin(kw, kb, fan_in, fan_out):
        bound = 1.0 / jnp.sqrt(fan_in)
        w = jax.random.uniform(kw, (fan_in, fan_out), jnp.float32, -bound, bound)
        b = jax.random.uniform(kb, (fan_out,), jnp.float32, -bound, bound)
        return w, b

    w1, b1 = lin(k1, k2, hidden_size, Hh)
    wg, bg = lin(k3, k4, Hh, 2)          # gaze_mean head
    ws, bs = lin(k5, k6, Hh, 1)          # stop head
    bs = jnp.full_like(bs, -2.0)         # stop_head.bias.data.fill_(-2.0)
    wv, bv = lin(k7, k8, Hh, 1)          # value head

    # fuse the three heads: columns [dx, dy, stop, value]
    wh = jnp.concatenate([wg, ws, wv], axis=1)       # (Hh, 4)
    bh = jnp.concatenate([bg, bs, bv], axis=0)       # (4,)
    log_std = jnp.zeros((2,), jnp.float32)           # gaze_log_std init = zeros

    return {"w1": w1, "b1": b1, "wh": wh, "bh": bh, "log_std": log_std}


def agent_forward_ref(h, params):
    """Pure-JAX f32 reference for a sanity check."""
    x = jnp.maximum(h @ params["w1"] + params["b1"], 0.0)
    heads = x @ params["wh"] + params["bh"]
    gaze_mean = jnp.tanh(heads[:, 0:2])
    gaze_std = jnp.clip(jnp.exp(params["log_std"]), 0.01, 1.0)
    stop_logit = heads[:, 2:3]
    state_value = heads[:, 3]
    return gaze_mean, gaze_std, stop_logit, state_value


if __name__ == "__main__":
    B = 16               # small test shape; exercises 2 batch tiles of 8
    HIDDEN = 32          # stand-in for the default hidden_size=512
    TILE_B = 8

    key = jax.random.PRNGKey(0)
    k_param, k_input = jax.random.split(key)
    params = init_params(k_param, HIDDEN)
    h = jax.random.normal(k_input, (B, HIDDEN), jnp.float32)

    outs = agent_forward(h, params, tile_b=TILE_B)
    outs = jax.block_until_ready(outs)
    gaze_mean, gaze_std, stop_logit, state_value = outs

    # sanity check against pure-JAX f32 reference (kernel matmuls run in bf16
    # with f32 accumulation, so use a bf16-appropriate tolerance).
    refs = agent_forward_ref(h, params)
    for o, r in zip(outs, refs):
        assert o.shape == r.shape, (o.shape, r.shape)
        assert jnp.allclose(o, r, atol=2e-2, rtol=2e-2), (o, r)
    # gaze_std is computed entirely in the wrapper -> exact
    assert jnp.allclose(gaze_std, refs[1], atol=1e-6)

    assert gaze_mean.shape == (B, 2)
    assert gaze_std.shape == (2,)
    assert stop_logit.shape == (B, 1)
    assert state_value.shape == (B,)

    print("KERNEL_OK")
</pallas_src>

<mosaic_0001>
module attributes {stable_mosaic.version = 11 : i64} {
  func.func @agent_kernel(%arg0: i32, %arg1: memref<8x32xf32, #tpu.memory_space<vmem>>, %arg2: memref<32x16xf32, #tpu.memory_space<vmem>>, %arg3: memref<1x16xf32, #tpu.memory_space<vmem>>, %arg4: memref<16x4xf32, #tpu.memory_space<vmem>>, %arg5: memref<1x4xf32, #tpu.memory_space<vmem>>, %arg6: memref<8x4xf32, #tpu.memory_space<vmem>>) attributes {dimension_semantics = [#tpu.dimension_semantics<parallel>], iteration_bounds = array<i64: 2>, scalar_prefetch = 0 : i64, scratch_operands = 0 : i64, tpu.core_type = #tpu.core_type<tc>, window_params = [{transform_indices = @transform_0, window_bounds = array<i64: 8, 32>}, {pipeline_mode = #tpu.pipeline_mode<synchronous>, transform_indices = @transform_1, window_bounds = array<i64: 32, 16>}, {pipeline_mode = #tpu.pipeline_mode<synchronous>, transform_indices = @transform_2, window_bounds = array<i64: 1, 16>}, {pipeline_mode = #tpu.pipeline_mode<synchronous>, transform_indices = @transform_3, window_bounds = array<i64: 16, 4>}, {pipeline_mode = #tpu.pipeline_mode<synchronous>, transform_indices = @transform_4, window_bounds = array<i64: 1, 4>}, {transform_indices = @transform_5, window_bounds = array<i64: 8, 4>}]} {
    %c0 = arith.constant 0 : index
    %c0_0 = arith.constant 0 : index
    %0 = vector.load %arg1[%c0, %c0_0] : memref<8x32xf32, #tpu.memory_space<vmem>>, vector<8x32xf32>
    %1 = arith.truncf %0 : vector<8x32xf32> to vector<8x32xbf16>
    %c0_1 = arith.constant 0 : index
    %c0_2 = arith.constant 0 : index
    %2 = vector.load %arg2[%c0_1, %c0_2] : memref<32x16xf32, #tpu.memory_space<vmem>>, vector<32x16xf32>
    %3 = arith.truncf %2 : vector<32x16xf32> to vector<32x16xbf16>
    %cst = arith.constant dense<0.000000e+00> : vector<8x16xf32>
    %4 = tpu.matmul %1, %3, %cst {dimension_numbers = #tpu.dot_dimension_numbers<[1], [0], [0], [1], [0, 0, 1, 1], [], []>} : vector<8x32xbf16>, vector<32x16xbf16>, vector<8x16xf32> -> vector<8x16xf32>
    %c0_3 = arith.constant 0 : index
    %c0_4 = arith.constant 0 : index
    %5 = vector.load %arg3[%c0_3, %c0_4] : memref<1x16xf32, #tpu.memory_space<vmem>>, vector<1x16xf32>
    %6 = vector.broadcast %5 : vector<1x16xf32> to vector<8x16xf32>
    %7 = arith.addf %4, %6 : vector<8x16xf32>
    %cst_5 = arith.constant 0.000000e+00 : f32
    %8 = vector.broadcast %cst_5 : f32 to vector<8x16xf32>
    %9 = arith.maximumf %7, %8 : vector<8x16xf32>
    %10 = arith.truncf %9 : vector<8x16xf32> to vector<8x16xbf16>
    %c0_6 = arith.constant 0 : index
    %c0_7 = arith.constant 0 : index
    %11 = vector.load %arg4[%c0_6, %c0_7] : memref<16x4xf32, #tpu.memory_space<vmem>>, vector<16x4xf32>
    %12 = arith.truncf %11 : vector<16x4xf32> to vector<16x4xbf16>
    %cst_8 = arith.constant dense<0.000000e+00> : vector<8x4xf32>
    %13 = tpu.matmul %10, %12, %cst_8 {dimension_numbers = #tpu.dot_dimension_numbers<[1], [0], [0], [1], [0, 0, 1, 1], [], []>} : vector<8x16xbf16>, vector<16x4xbf16>, vector<8x4xf32> -> vector<8x4xf32>
    %c0_9 = arith.constant 0 : index
    %c0_10 = arith.constant 0 : index
    %14 = vector.load %arg5[%c0_9, %c0_10] : memref<1x4xf32, #tpu.memory_space<vmem>>, vector<1x4xf32>
    %15 = vector.broadcast %14 : vector<1x4xf32> to vector<8x4xf32>
    %16 = arith.addf %13, %15 : vector<8x4xf32>
    %17 = tpu.iota {dimensions = array<i32: 1>} : vector<8x4xi32>
    %c2_i32 = arith.constant 2 : i32
    %18 = vector.broadcast %c2_i32 : i32 to vector<8x4xi32>
    %19 = arith.cmpi slt, %17, %18 : vector<8x4xi32>
    %20 = math.tanh %16 : vector<8x4xf32>
    %21 = arith.select %19, %20, %16 : vector<8x4xi1>, vector<8x4xf32>
    %c0_11 = arith.constant 0 : index
    %c0_12 = arith.constant 0 : index
    %22 = vector.load %arg6[%c0_11, %c0_12] : memref<8x4xf32, #tpu.memory_space<vmem>>, vector<8x4xf32>
    tpu.vector_store %arg6[%c0_11, %c0_12], %21 {strides = array<i32>} : memref<8x4xf32, #tpu.memory_space<vmem>>, vector<8x4xf32>,
    return
  }
  func.func @transform_0(%arg0: i32) -> (i32, i32) {
    %c0_i32 = arith.constant 0 : i32
    %c0_i32_0 = arith.constant 0 : i32
    return %arg0, %c0_i32 : i32, i32
  }
  func.func @transform_1(%arg0: i32) -> (i32, i32) {
    %c0_i32 = arith.constant 0 : i32
    %c0_i32_0 = arith.constant 0 : i32
    %c0_i32_1 = arith.constant 0 : i32
    return %c0_i32, %c0_i32_0 : i32, i32
  }
  func.func @transform_2(%arg0: i32) -> (i32, i32) {
    %c0_i32 = arith.constant 0 : i32
    %c0_i32_0 = arith.constant 0 : i32
    %c0_i32_1 = arith.constant 0 : i32
    return %c0_i32, %c0_i32_0 : i32, i32
  }
  func.func @transform_3(%arg0: i32) -> (i32, i32) {
    %c0_i32 = arith.constant 0 : i32
    %c0_i32_0 = arith.constant 0 : i32
    %c0_i32_1 = arith.constant 0 : i32
    return %c0_i32, %c0_i32_0 : i32, i32
  }
  func.func @transform_4(%arg0: i32) -> (i32, i32) {
    %c0_i32 = arith.constant 0 : i32
    %c0_i32_0 = arith.constant 0 : i32
    %c0_i32_1 = arith.constant 0 : i32
    return %c0_i32, %c0_i32_0 : i32, i32
  }
  func.func @transform_5(%arg0: i32) -> (i32, i32) {
    %c0_i32 = arith.constant 0 : i32
    %c0_i32_0 = arith.constant 0 : i32
    return %arg0, %c0_i32 : i32, i32
  }
}

</mosaic_0001>

<bundles_post_ra>
// kernel: tpu_custom_call.1
= control target key start
LH: loop header
LB: loop body
LE: loop exit
PB: predicated region body
PF: predicated region fallthrough
CT: control target
= control target key end

     0   :  { %s480_s18 = smov 0   ;;  %s528_s0 = inlined_call_operand.vmem [shape: f32[16,32], index: 0, kind: input, shape index: {}]   ;;  %s529_s1 = inlined_call_operand.vmem [shape: f32[32,16], index: 1, kind: input, shape index: {}]   ;;  %s530_s2 = inlined_call_operand.vmem [shape: f32[1,16], index: 2, kind: input, shape index: {}]   ;;  %s531_s3 = inlined_call_operand.vmem [shape: f32[16,4], index: 3, kind: input, shape index: {}]   ;;  %s532_s4 = inlined_call_operand.vmem [shape: f32[1,4], index: 4, kind: input, shape index: {}]   ;;  %s533_s5 = inlined_call_operand.vmem [shape: f32[16,4], index: 5, kind: output, shape index: {}]  }
   0x1 LB: > { %s396_s19 = sadd.s32 4294967295, %s446_s18   ;;  %p400_p0 = scmp.ge.s32.totalorder %s446_s18, 1  ;;  %s446_s18 = sphi %s480_s18, %s15_s18  }
   0x2   : > { %p186_p1 = scmp.lt.s32.totalorder %s446_s18, 3 }
   0x4   : > { %p187_p2 = pnand %p400_p0, %p186_p1 }
   0x5   : > { %v223_v0 = vld [vmem:[%s529_s1] sm:$0xff] (!%p187_p2)  ;;  %v224_v1 = vld [vmem:[%s529_s1 + $0x8] sm:$0xff] (!%p187_p2)  ;;  %v225_v2 = vld [vmem:[%s529_s1 + $0x10] sm:$0xff] (!%p187_p2)  ;;  %p212_p3 = scmp.lt.s32.totalorder (!%p187_p2), %s396_s19, 1  ;;  %v448_v3 = vmov (!%p187_p2), 0.0   ;;  %vm449_vm0 = vmmov (!%p187_p2), 0   ;;  %v336_v25 = vlaneseq (!%p187_p2) }
   0x6   : > { %190 = sbr.rel (%p187_p2) target bundleno = 464 (0x1d0), region = 40  ;;  %414 = vmatprep.subr.bf16.mxu0 (!%p187_p2), %v448_v3  ;;  %v227_v4 = vpack.c.bf16 (!%p187_p2), %v224_v1, %v223_v0  ;;  %v226_v5 = vld [vmem:[%s529_s1 + $0x18] sm:$0xff] (!%p187_p2)  ;;  %418 = vmatprep.mubr.msk.bf16.mxu0 (!%p187_p2), %vm449_vm0, %v448_v3  ;;  %vm236_vm1 = vcmask (!%p187_p2), 261120   ;;  %v282_v9 = vld [vmem:[%s531_s3] sm:$0xff] (!%p187_p2)  ;;  %v283_v10 = vld [vmem:[%s531_s3 + $0x8] sm:$0xff] (!%p187_p2)  ;;  %vm292_vm2 = vcmask (!%p187_p2), 130048  }
   0x7   : > { %422 = vmatprep.subr.bf16.mxu1 (!%p187_p2), %v448_v3  ;;  %424 = vmatprep.mubr.msk.bf16.mxu1 (!%p187_p2), %vm449_vm0, %v448_v3  ;;  %v228_v6 = vpack.c.bf16 (!%p187_p2), %v226_v5, %v225_v2  ;;  %v284_v11 = vpack.c.bf16 (!%p187_p2), %v283_v10, %v282_v9  ;;  %v403_v12 = vld [vmem:[%s530_s2] ss:$0 sm:$0xff] (!%p187_p2)  ;;  %v337_v27 = vand.u32 (!%p187_p2), 127, %v336_v25  ;;  %vm341_vm4 = vcmask (!%p187_p2), 31744  }
   0x8   : > { %415 = vmatpush3.bf16.msra.mxu0 (!%p187_p2), %v227_v4  ;;  %v405_v20 = vld [vmem:[%s532_s4] ss:$0 sm:$0xff] (!%p187_p2) }
   0x9   : > { %416 = vmatprep.subr.bf16.mxu0 (!%p187_p2), %v448_v3  ;;  %423 = vmatpush3.bf16.msra.mxu1 (!%p187_p2), %v284_v11  ;;  %vm338_vm3 = vcmp.lt.s32.totalorder (!%p187_p2), %v337_v27, 2 }
   0xc   : > { %417 = vmatpush3.bf16.msra.mxu0 (!%p187_p2), %v228_v6 }
   0xd   : > { %s535_s19 = smov (!%p212_p3, %s396_s19), 1 }
   0xe   : > { %s401_s28 = sshll.u32 %s535_s19, 3 }
   0xf   : > { %s215_s6 = scalar_lea.vmem %s528_s0, %s401_s28  ;;  %s219_s17 = scalar_lea.vmem %s533_s5, %s401_s28 }
  0x10   : > { %v221_v7 = vld [vmem:[%s215_s6] sm:$0xff] }
  0x11   : > { %v222_v8 = vpack.c.bf16 %v221_v7, %v221_v7 }
  0x13   : > { %419 = vmatmul.mubr.msk.bf16.vlgmr.msra.gmra.mrb[0].mxu0 %vm236_vm1, %v222_v8 }
  0xe6   : > { %v274_v13 = vpop.f32.mrb[0].mxu0 }
  0xe7   : > { %v275_v14 = vadd.f32 %v403_v12, %v274_v13  ;;  %v420_v15 = vpop.f32.mrb[1].mxu0 }
  0xe8   : > { %v277_v16 = vpop.f32.mrb[2].mxu0 }
  0xe9   : > { %v280_v17 = vmax.f32 %v275_v14, 0.0  ;;  %v421_v18 = vpop.f32.mrb[3].mxu0 }
  0xeb   : > { %v281_v19 = vpack.c.bf16 %v280_v17, %v280_v17 }
  0xed   : > { %425 = vmatmul.mubr.msk.bf16.vlgmr.msra.gmra.mrb[0].mxu1 %vm292_vm2, %v281_v19 }
 0x1c0   : > { %v330_v21 = vpop.f32.mrb[0].mxu1 }
 0x1c1   : > { %v331_v22 = vadd.f32 %v405_v20, %v330_v21  ;;  %v426_v23 = vpop.f32.mrb[1].mxu1 }
 0x1c2   : > { %v333_v24 = vpop.f32.mrb[2].mxu1 }
 0x1c3   : > { %438 = vtanh.f32 %v331_v22  ;;  %v427_v26 = vpop.f32.mrb[3].mxu1 }
 0x1cd   : > { %v439_v28 = vpop.eup %438 }
 0x1ce   : > { %v340_v29 = vsel %vm338_vm3, %v439_v28, %v331_v22 }
 0x1cf   : > { %342 = vst.msk [vmem:[%s219_s17] sm:$0xff] %vm341_vm4, %v340_v29 }
 0x1d0 PF: > { %s15_s18 = sadd.s32 1, %s446_s18  }
 0x1d1   : > { %p12_p4 = scmp.ge.s32.totalorder %s15_s18, 4  }
 0x1d3   :  { %14 = sbr.rel (!%p12_p4) target bundleno = 1 (0x1), region = 70 }

</bundles_post_ra>
